<compile_context>
chip_gen: v7x
topology: tpu7x:2x2x1
jax: 0.10.0
libtpu: 0.0.40
codegen_flags: <defaults>
</compile_context>

<pallas_src>
import functools

import jax
import jax.numpy as jnp
from jax import lax
from jax.experimental import pallas as pl
from jax.experimental.pallas import tpu as pltpu

TEMPERATURE = 0.5
INV_TEMP = 1.0 / TEMPERATURE
# Rows are unit-normalized => |cosine| <= 1 => |logit| <= 1/temperature, so a
# constant shift keeps exp() in a safe range without a running max.
MAX_LOGIT = INV_TEMP


def _clip_loss_kernel(zi_ref, zj_ref, out_ref,
                      row_sum_ref, diag_ref, col_sum_ref,
                      row_lse_acc_ref, diag_acc_ref, *, batch):
    i = pl.program_id(0)          # row-tile index (rows of z_i)
    j = pl.program_id(1)          # col-tile index (rows of z_j), innermost
    ni = pl.num_programs(0)
    nj = pl.num_programs(1)

    # ---- one-time init of persistent accumulators ---------------------------
    @pl.when((i == 0) & (j == 0))
    def _init_global():
        col_sum_ref[...] = jnp.zeros_like(col_sum_ref)
        row_lse_acc_ref[...] = jnp.zeros_like(row_lse_acc_ref)
        diag_acc_ref[...] = jnp.zeros_like(diag_acc_ref)

    # ---- per-row-tile init ---------------------------------------------------
    @pl.when(j == 0)
    def _init_row():
        row_sum_ref[...] = jnp.zeros_like(row_sum_ref)

    # ---- normalize current tiles (F.normalize: x / max(||x||, 1e-12)) -------
    zi = zi_ref[...].astype(jnp.float32)
    zj = zj_ref[...].astype(jnp.float32)
    zi_inv = 1.0 / jnp.maximum(jnp.sqrt(jnp.sum(zi * zi, -1, keepdims=True)), 1e-12)
    zj_inv = 1.0 / jnp.maximum(jnp.sqrt(jnp.sum(zj * zj, -1, keepdims=True)), 1e-12)
    zi_n = zi * zi_inv
    zj_n = zj * zj_inv

    # ---- positive-pair (diagonal) logits: O(T*D) elementwise, kept in f32 ---
    @pl.when(i == j)
    def _diag():
        diag_ref[...] = jnp.sum(zi_n * zj_n, -1, keepdims=True) * INV_TEMP

    # ---- similarity tile on the MXU: bf16 operands, f32 accumulation --------
    s = lax.dot_general(
        zi_n.astype(jnp.bfloat16), zj_n.astype(jnp.bfloat16),
        dimension_numbers=(((1,), (1,)), ((), ())),
        preferred_element_type=jnp.float32) * INV_TEMP              # (T, T)

    # One exp pass shared by row and column softmax statistics.
    e = jnp.exp(s - MAX_LOGIT)                                      # (T, T)
    row_sum_ref[...] += jnp.sum(e, -1, keepdims=True)               # (T, 1)
    col_cur = col_sum_ref[pl.ds(j, 1), :]                           # (1, T)
    col_sum_ref[pl.ds(j, 1), :] = col_cur + jnp.sum(e, 0, keepdims=True)

    # ---- finalize one row tile ----------------------------------------------
    @pl.when(j == nj - 1)
    def _row_done():
        row_lse = jnp.log(row_sum_ref[...]) + MAX_LOGIT             # (T, 1)
        row_lse_acc_ref[...] += row_lse
        diag_acc_ref[...] += diag_ref[...]

    # ---- finalize the whole loss at the last grid step -----------------------
    @pl.when((i == ni - 1) & (j == nj - 1))
    def _done():
        row_lse_sum = jnp.sum(row_lse_acc_ref[...], keepdims=True)          # (1,1)
        diag_sum = jnp.sum(diag_acc_ref[...], keepdims=True)                # (1,1)
        col_lse_sum = (jnp.sum(jnp.log(col_sum_ref[...]), keepdims=True)
                       + MAX_LOGIT * batch)                                  # (1,1)
        out_ref[...] = 0.5 * (row_lse_sum + col_lse_sum - 2.0 * diag_sum) / batch


def _pick_tile(b):
    # 256-granular preferred (v6e/v7x MXU), 128 ok (v5e); fall back to smaller.
    for t in (256, 128, 64, 32, 16, 8):
        if b % t == 0:
            return t
    # TODO(synk): batches not divisible by 8 run as a single full-batch block.
    return b


def clip_loss(z_i, z_j):
    """Pallas CLIPLoss forward.  z_i, z_j: (batch, features). Returns scalar f32."""
    assert z_i.shape == z_j.shape and z_i.ndim == 2
    B, D = z_i.shape
    T = _pick_tile(B)
    nt = B // T

    kernel = functools.partial(_clip_loss_kernel, batch=B)

    grid_spec = pltpu.PrefetchScalarGridSpec(
        num_scalar_prefetch=0,
        grid=(nt, nt),
        in_specs=[
            pl.BlockSpec((T, D), lambda i, j: (i, 0)),   # z_i row tile
            pl.BlockSpec((T, D), lambda i, j: (j, 0)),   # z_j column tile
        ],
        out_specs=pl.BlockSpec((1, 1), lambda i, j: (0, 0)),
        scratch_shapes=[
            pltpu.VMEM((T, 1), jnp.float32),     # running row exp-sums (current row tile)
            pltpu.VMEM((T, 1), jnp.float32),     # diag logits of current row tile
            pltpu.VMEM((nt, T), jnp.float32),    # running column exp-sums (all B columns)
            pltpu.VMEM((T, 1), jnp.float32),     # accumulated row LSE
            pltpu.VMEM((T, 1), jnp.float32),     # accumulated diag logits
        ],
    )

    itemsize = jnp.dtype(z_i.dtype).itemsize
    cost = pl.CostEstimate(
        flops=int(2 * B * B * D + 8 * B * D),
        transcendentals=int(B * B + 2 * B),
        bytes_accessed=int(2 * B * D * itemsize + 4),
    )

    # Both grid axes carry cross-step state (column sums / running accumulators),
    # so they stay "arbitrary"; megacore sharding would need per-core partials
    # plus a cross-core combine.
    out = pl.pallas_call(
        kernel,
        out_shape=jax.ShapeDtypeStruct((1, 1), jnp.float32),
        grid_spec=grid_spec,
        compiler_params=pltpu.CompilerParams(
            dimension_semantics=("arbitrary", "arbitrary"),
            vmem_limit_bytes=32 * 1024 * 1024,
        ),
        cost_estimate=cost,
    )(z_i, z_j)
    return out[0, 0]


def _reference_clip_loss(z_i, z_j, temperature=TEMPERATURE):
    # Pure-JAX reference mirroring the PyTorch module exactly (f32 throughout).
    B = z_i.shape[0]
    zi_n = z_i / jnp.maximum(jnp.linalg.norm(z_i, axis=-1, keepdims=True), 1e-12)
    zj_n = z_j / jnp.maximum(jnp.linalg.norm(z_j, axis=-1, keepdims=True), 1e-12)
    rep = jnp.concatenate([zi_n, zj_n], axis=0)
    sim = rep @ rep.T
    logits = sim / temperature
    labels = jnp.arange(B)

    def ce(lg):
        lse = jax.nn.logsumexp(lg, axis=-1)
        picked = lg[jnp.arange(B), labels]
        return jnp.mean(lse - picked)

    loss_i = ce(logits[:B, B:])
    loss_j = ce(logits[B:, :B])
    return (loss_i + loss_j) / 2.0


if __name__ == "__main__":
    key = jax.random.PRNGKey(0)
    k1, k2, k3, k4 = jax.random.split(key, 4)

    # Case 1: single-tile path (B=8, D=32).
    z_i = jax.random.normal(k1, (8, 32), dtype=jnp.float32)
    z_j = jax.random.normal(k2, (8, 32), dtype=jnp.float32)
    loss = jax.block_until_ready(clip_loss(z_i, z_j))
    ref = jax.block_until_ready(_reference_clip_loss(z_i, z_j))
    # bf16 MXU operands (f32 accumulate) -> relaxed tolerance vs f32 reference.
    assert jnp.allclose(loss, ref, atol=5e-2, rtol=5e-2), (loss, ref)

    # Case 2: multi-tile path (B=24 -> 3x3 grid of 8-row tiles) exercising the
    # streaming row/column accumulation and scratch reuse.
    z_i2 = jax.random.normal(k3, (24, 32), dtype=jnp.float32)
    z_j2 = jax.random.normal(k4, (24, 32), dtype=jnp.float32)
    loss2 = jax.block_until_ready(clip_loss(z_i2, z_j2))
    ref2 = jax.block_until_ready(_reference_clip_loss(z_i2, z_j2))
    assert jnp.allclose(loss2, ref2, atol=5e-2, rtol=5e-2), (loss2, ref2)

    print("KERNEL_OK")
</pallas_src>

<mosaic_0001>
module attributes {stable_mosaic.version = 11 : i64} {
  func.func @_clip_loss_kernel(%arg0: i32, %arg1: i32, %arg2: memref<8x32xf32, #tpu.memory_space<vmem>>, %arg3: memref<8x32xf32, #tpu.memory_space<vmem>>, %arg4: memref<1x1xf32, #tpu.memory_space<vmem>>, %arg5: memref<8x1xf32, #tpu.memory_space<vmem>>, %arg6: memref<8x1xf32, #tpu.memory_space<vmem>>, %arg7: memref<1x8xf32, #tpu.memory_space<vmem>>, %arg8: memref<8x1xf32, #tpu.memory_space<vmem>>, %arg9: memref<8x1xf32, #tpu.memory_space<vmem>>) attributes {dimension_semantics = [#tpu.dimension_semantics<arbitrary>, #tpu.dimension_semantics<arbitrary>], iteration_bounds = array<i64: 1, 1>, scalar_prefetch = 0 : i64, scratch_operands = 5 : i64, tpu.core_type = #tpu.core_type<tc>, window_params = [{transform_indices = @transform_0, window_bounds = array<i64: 8, 32>}, {transform_indices = @transform_1, window_bounds = array<i64: 8, 32>}, {pipeline_mode = #tpu.pipeline_mode<synchronous>, transform_indices = @transform_2, window_bounds = array<i64: 1, 1>}]} {
    %c0_i32 = arith.constant 0 : i32
    %0 = arith.cmpi eq, %arg0, %c0_i32 : i32
    %c0_i32_0 = arith.constant 0 : i32
    %1 = arith.cmpi eq, %arg1, %c0_i32_0 : i32
    %2 = arith.andi %0, %1 : i1
    %3 = arith.extui %2 : i1 to i32
    %c0_i32_1 = arith.constant 0 : i32
    %4 = arith.cmpi ne, %3, %c0_i32_1 : i32
    scf.if %4 {
      %cst_29 = arith.constant 0.000000e+00 : f32
      %61 = vector.broadcast %cst_29 : f32 to vector<1x8xf32>
      %c0_30 = arith.constant 0 : index
      %c0_31 = arith.constant 0 : index
      %62 = vector.load %arg7[%c0_30, %c0_31] : memref<1x8xf32, #tpu.memory_space<vmem>>, vector<1x8xf32>
      tpu.vector_store %arg7[%c0_30, %c0_31], %61 {strides = array<i32>} : memref<1x8xf32, #tpu.memory_space<vmem>>, vector<1x8xf32>,
      %cst_32 = arith.constant 0.000000e+00 : f32
      %63 = vector.broadcast %cst_32 : f32 to vector<8x1xf32>
      %c0_33 = arith.constant 0 : index
      %c0_34 = arith.constant 0 : index
      %64 = vector.load %arg8[%c0_33, %c0_34] : memref<8x1xf32, #tpu.memory_space<vmem>>, vector<8x1xf32>
      tpu.vector_store %arg8[%c0_33, %c0_34], %63 {strides = array<i32>} : memref<8x1xf32, #tpu.memory_space<vmem>>, vector<8x1xf32>,
      %cst_35 = arith.constant 0.000000e+00 : f32
      %65 = vector.broadcast %cst_35 : f32 to vector<8x1xf32>
      %c0_36 = arith.constant 0 : index
      %c0_37 = arith.constant 0 : index
      %66 = vector.load %arg9[%c0_36, %c0_37] : memref<8x1xf32, #tpu.memory_space<vmem>>, vector<8x1xf32>
      tpu.vector_store %arg9[%c0_36, %c0_37], %65 {strides = array<i32>} : memref<8x1xf32, #tpu.memory_space<vmem>>, vector<8x1xf32>,
    } else {
    }
    %c0_i32_2 = arith.constant 0 : i32
    %5 = arith.cmpi eq, %arg1, %c0_i32_2 : i32
    %6 = arith.extui %5 : i1 to i32
    %c0_i32_3 = arith.constant 0 : i32
    %7 = arith.cmpi ne, %6, %c0_i32_3 : i32
    scf.if %7 {
      %cst_29 = arith.constant 0.000000e+00 : f32
      %61 = vector.broadcast %cst_29 : f32 to vector<8x1xf32>
      %c0_30 = arith.constant 0 : index
      %c0_31 = arith.constant 0 : index
      %62 = vector.load %arg5[%c0_30, %c0_31] : memref<8x1xf32, #tpu.memory_space<vmem>>, vector<8x1xf32>
      tpu.vector_store %arg5[%c0_30, %c0_31], %61 {strides = array<i32>} : memref<8x1xf32, #tpu.memory_space<vmem>>, vector<8x1xf32>,
    } else {
    }
    %c0 = arith.constant 0 : index
    %c0_4 = arith.constant 0 : index
    %8 = vector.load %arg2[%c0, %c0_4] : memref<8x32xf32, #tpu.memory_space<vmem>>, vector<8x32xf32>
    %c0_5 = arith.constant 0 : index
    %c0_6 = arith.constant 0 : index
    %9 = vector.load %arg3[%c0_5, %c0_6] : memref<8x32xf32, #tpu.memory_space<vmem>>, vector<8x32xf32>
    %10 = arith.mulf %8, %8 : vector<8x32xf32>
    %cst = arith.constant dense<0.000000e+00> : vector<8xf32>
    %11 = vector.multi_reduction <add>, %10, %cst [1] : vector<8x32xf32> to vector<8xf32>
    %12 = vector.shape_cast %11 : vector<8xf32> to vector<8x1xf32>
    %13 = math.sqrt %12 : vector<8x1xf32>
    %cst_7 = arith.constant 9.99999996E-13 : f32
    %14 = vector.broadcast %cst_7 : f32 to vector<8x1xf32>
    %15 = arith.maximumf %13, %14 : vector<8x1xf32>
    %cst_8 = arith.constant 1.000000e+00 : f32
    %16 = vector.broadcast %cst_8 : f32 to vector<8x1xf32>
    %17 = arith.divf %16, %15 : vector<8x1xf32>
    %18 = arith.mulf %9, %9 : vector<8x32xf32>
    %cst_9 = arith.constant dense<0.000000e+00> : vector<8xf32>
    %19 = vector.multi_reduction <add>, %18, %cst_9 [1] : vector<8x32xf32> to vector<8xf32>
    %20 = vector.shape_cast %19 : vector<8xf32> to vector<8x1xf32>
    %21 = math.sqrt %20 : vector<8x1xf32>
    %cst_10 = arith.constant 9.99999996E-13 : f32
    %22 = vector.broadcast %cst_10 : f32 to vector<8x1xf32>
    %23 = arith.maximumf %21, %22 : vector<8x1xf32>
    %cst_11 = arith.constant 1.000000e+00 : f32
    %24 = vector.broadcast %cst_11 : f32 to vector<8x1xf32>
    %25 = arith.divf %24, %23 : vector<8x1xf32>
    %26 = vector.broadcast %17 : vector<8x1xf32> to vector<8x32xf32>
    %27 = arith.mulf %8, %26 : vector<8x32xf32>
    %28 = vector.broadcast %25 : vector<8x1xf32> to vector<8x32xf32>
    %29 = arith.mulf %9, %28 : vector<8x32xf32>
    %30 = arith.cmpi eq, %arg0, %arg1 : i32
    %31 = arith.extui %30 : i1 to i32
    %c0_i32_12 = arith.constant 0 : i32
    %32 = arith.cmpi ne, %31, %c0_i32_12 : i32
    scf.if %32 {
      %61 = arith.mulf %27, %29 : vector<8x32xf32>
      %cst_29 = arith.constant dense<0.000000e+00> : vector<8xf32>
      %62 = vector.multi_reduction <add>, %61, %cst_29 [1] : vector<8x32xf32> to vector<8xf32>
      %63 = vector.shape_cast %62 : vector<8xf32> to vector<8x1xf32>
      %cst_30 = arith.constant 2.000000e+00 : f32
      %64 = vector.broadcast %cst_30 : f32 to vector<8x1xf32>
      %65 = arith.mulf %63, %64 : vector<8x1xf32>
      %c0_31 = arith.constant 0 : index
      %c0_32 = arith.constant 0 : index
      %66 = vector.load %arg6[%c0_31, %c0_32] : memref<8x1xf32, #tpu.memory_space<vmem>>, vector<8x1xf32>
      tpu.vector_store %arg6[%c0_31, %c0_32], %65 {strides = array<i32>} : memref<8x1xf32, #tpu.memory_space<vmem>>, vector<8x1xf32>,
    } else {
    }
    %33 = arith.truncf %27 : vector<8x32xf32> to vector<8x32xbf16>
    %34 = arith.truncf %29 : vector<8x32xf32> to vector<8x32xbf16>
    %cst_13 = arith.constant dense<0.000000e+00> : vector<8x8xf32>
    %35 = tpu.matmul %33, %34, %cst_13 {dimension_numbers = #tpu.dot_dimension_numbers<[1], [1], [0], [0], [0, 0, 1, 0], [], []>} : vector<8x32xbf16>, vector<8x32xbf16>, vector<8x8xf32> -> vector<8x8xf32>
    %cst_14 = arith.constant 2.000000e+00 : f32
    %36 = vector.broadcast %cst_14 : f32 to vector<8x8xf32>
    %37 = arith.mulf %35, %36 : vector<8x8xf32>
    %cst_15 = arith.constant 2.000000e+00 : f32
    %38 = vector.broadcast %cst_15 : f32 to vector<8x8xf32>
    %39 = arith.subf %37, %38 : vector<8x8xf32>
    %40 = math.exp %39 : vector<8x8xf32>
    %c0_16 = arith.constant 0 : index
    %c0_17 = arith.constant 0 : index
    %41 = vector.load %arg5[%c0_16, %c0_17] : memref<8x1xf32, #tpu.memory_space<vmem>>, vector<8x1xf32>
    %cst_18 = arith.constant dense<0.000000e+00> : vector<8xf32>
    %42 = vector.multi_reduction <add>, %40, %cst_18 [1] : vector<8x8xf32> to vector<8xf32>
    %43 = vector.shape_cast %42 : vector<8xf32> to vector<8x1xf32>
    %44 = arith.addf %41, %43 : vector<8x1xf32>
    %c0_19 = arith.constant 0 : index
    %c0_20 = arith.constant 0 : index
    %45 = vector.load %arg5[%c0_19, %c0_20] : memref<8x1xf32, #tpu.memory_space<vmem>>, vector<8x1xf32>
    tpu.vector_store %arg5[%c0_19, %c0_20], %44 {strides = array<i32>} : memref<8x1xf32, #tpu.memory_space<vmem>>, vector<8x1xf32>,
    %46 = arith.index_cast %arg1 : i32 to index
    %c0_21 = arith.constant 0 : index
    %47 = vector.load %arg7[%46, %c0_21] : memref<1x8xf32, #tpu.memory_space<vmem>>, vector<1x8xf32>
    %cst_22 = arith.constant dense<0.000000e+00> : vector<8xf32>
    %48 = vector.multi_reduction <add>, %40, %cst_22 [0] : vector<8x8xf32> to vector<8xf32>
    %49 = vector.shape_cast %48 : vector<8xf32> to vector<1x8xf32>
    %50 = arith.addf %47, %49 : vector<1x8xf32>
    %51 = arith.index_cast %arg1 : i32 to index
    %c0_23 = arith.constant 0 : index
    %52 = vector.load %arg7[%51, %c0_23] : memref<1x8xf32, #tpu.memory_space<vmem>>, vector<1x8xf32>
    tpu.vector_store %arg7[%51, %c0_23], %50 {strides = array<i32>} : memref<1x8xf32, #tpu.memory_space<vmem>>, vector<1x8xf32>,
    %c0_i32_24 = arith.constant 0 : i32
    %53 = arith.cmpi eq, %arg1, %c0_i32_24 : i32
    %54 = arith.extui %53 : i1 to i32
    %c0_i32_25 = arith.constant 0 : i32
    %55 = arith.cmpi ne, %54, %c0_i32_25 : i32
    scf.if %55 {
      %c0_29 = arith.constant 0 : index
      %c0_30 = arith.constant 0 : index
      %61 = vector.load %arg5[%c0_29, %c0_30] : memref<8x1xf32, #tpu.memory_space<vmem>>, vector<8x1xf32>
      %62 = math.log %61 : vector<8x1xf32>
      %cst_31 = arith.constant 2.000000e+00 : f32
      %63 = vector.broadcast %cst_31 : f32 to vector<8x1xf32>
      %64 = arith.addf %62, %63 : vector<8x1xf32>
      %c0_32 = arith.constant 0 : index
      %c0_33 = arith.constant 0 : index
      %65 = vector.load %arg8[%c0_32, %c0_33] : memref<8x1xf32, #tpu.memory_space<vmem>>, vector<8x1xf32>
      %66 = arith.addf %65, %64 : vector<8x1xf32>
      %c0_34 = arith.constant 0 : index
      %c0_35 = arith.constant 0 : index
      %67 = vector.load %arg8[%c0_34, %c0_35] : memref<8x1xf32, #tpu.memory_space<vmem>>, vector<8x1xf32>
      tpu.vector_store %arg8[%c0_34, %c0_35], %66 {strides = array<i32>} : memref<8x1xf32, #tpu.memory_space<vmem>>, vector<8x1xf32>,
      %c0_36 = arith.constant 0 : index
      %c0_37 = arith.constant 0 : index
      %68 = vector.load %arg9[%c0_36, %c0_37] : memref<8x1xf32, #tpu.memory_space<vmem>>, vector<8x1xf32>
      %c0_38 = arith.constant 0 : index
      %c0_39 = arith.constant 0 : index
      %69 = vector.load %arg6[%c0_38, %c0_39] : memref<8x1xf32, #tpu.memory_space<vmem>>, vector<8x1xf32>
      %70 = arith.addf %68, %69 : vector<8x1xf32>
      %c0_40 = arith.constant 0 : index
      %c0_41 = arith.constant 0 : index
      %71 = vector.load %arg9[%c0_40, %c0_41] : memref<8x1xf32, #tpu.memory_space<vmem>>, vector<8x1xf32>
      tpu.vector_store %arg9[%c0_40, %c0_41], %70 {strides = array<i32>} : memref<8x1xf32, #tpu.memory_space<vmem>>, vector<8x1xf32>,
    } else {
    }
    %c0_i32_26 = arith.constant 0 : i32
    %56 = arith.cmpi eq, %arg0, %c0_i32_26 : i32
    %c0_i32_27 = arith.constant 0 : i32
    %57 = arith.cmpi eq, %arg1, %c0_i32_27 : i32
    %58 = arith.andi %56, %57 : i1
    %59 = arith.extui %58 : i1 to i32
    %c0_i32_28 = arith.constant 0 : i32
    %60 = arith.cmpi ne, %59, %c0_i32_28 : i32
    scf.if %60 {
      %c0_29 = arith.constant 0 : index
      %c0_30 = arith.constant 0 : index
      %61 = vector.load %arg8[%c0_29, %c0_30] : memref<8x1xf32, #tpu.memory_space<vmem>>, vector<8x1xf32>
      %62 = vector.shape_cast %61 : vector<8x1xf32> to vector<1x8x1xf32>
      %cst_31 = arith.constant dense<0.000000e+00> : vector<1xf32>
      %63 = vector.multi_reduction <add>, %62, %cst_31 [1, 2] : vector<1x8x1xf32> to vector<1xf32>
      %64 = vector.shape_cast %63 : vector<1xf32> to vector<1x1x1xf32>
      %65 = vector.extract %64[0, 0, 0] : f32 from vector<1x1x1xf32>
      %66 = vector.broadcast %65 : f32 to vector<1x1xf32>
      %c0_32 = arith.constant 0 : index
      %c0_33 = arith.constant 0 : index
      %67 = vector.load %arg9[%c0_32, %c0_33] : memref<8x1xf32, #tpu.memory_space<vmem>>, vector<8x1xf32>
      %68 = vector.shape_cast %67 : vector<8x1xf32> to vector<1x8x1xf32>
      %cst_34 = arith.constant dense<0.000000e+00> : vector<1xf32>
      %69 = vector.multi_reduction <add>, %68, %cst_34 [1, 2] : vector<1x8x1xf32> to vector<1xf32>
      %70 = vector.shape_cast %69 : vector<1xf32> to vector<1x1x1xf32>
      %71 = vector.extract %70[0, 0, 0] : f32 from vector<1x1x1xf32>
      %72 = vector.broadcast %71 : f32 to vector<1x1xf32>
      %c0_35 = arith.constant 0 : index
      %c0_36 = arith.constant 0 : index
      %73 = vector.load %arg7[%c0_35, %c0_36] : memref<1x8xf32, #tpu.memory_space<vmem>>, vector<1x8xf32>
      %74 = math.log %73 : vector<1x8xf32>
      %75 = vector.shape_cast %74 : vector<1x8xf32> to vector<1x1x8xf32>
      %cst_37 = arith.constant dense<0.000000e+00> : vector<1xf32>
      %76 = vector.multi_reduction <add>, %75, %cst_37 [1, 2] : vector<1x1x8xf32> to vector<1xf32>
      %77 = vector.shape_cast %76 : vector<1xf32> to vector<1x1x1xf32>
      %78 = vector.extract %77[0, 0, 0] : f32 from vector<1x1x1xf32>
      %79 = vector.broadcast %78 : f32 to vector<1x1xf32>
      %cst_38 = arith.constant 1.600000e+01 : f32
      %80 = vector.broadcast %cst_38 : f32 to vector<1x1xf32>
      %81 = arith.addf %79, %80 : vector<1x1xf32>
      %82 = arith.addf %66, %81 : vector<1x1xf32>
      %cst_39 = arith.constant 2.000000e+00 : f32
      %83 = vector.broadcast %cst_39 : f32 to vector<1x1xf32>
      %84 = arith.mulf %83, %72 : vector<1x1xf32>
      %85 = arith.subf %82, %84 : vector<1x1xf32>
      %cst_40 = arith.constant 5.000000e-01 : f32
      %86 = vector.broadcast %cst_40 : f32 to vector<1x1xf32>
      %87 = arith.mulf %86, %85 : vector<1x1xf32>
      %cst_41 = arith.constant 8.000000e+00 : f32
      %88 = vector.broadcast %cst_41 : f32 to vector<1x1xf32>
      %89 = arith.divf %87, %88 : vector<1x1xf32>
      %c0_42 = arith.constant 0 : index
      %c0_43 = arith.constant 0 : index
      %90 = vector.load %arg4[%c0_42, %c0_43] : memref<1x1xf32, #tpu.memory_space<vmem>>, vector<1x1xf32>
      tpu.vector_store %arg4[%c0_42, %c0_43], %89 {strides = array<i32>} : memref<1x1xf32, #tpu.memory_space<vmem>>, vector<1x1xf32>,
    } else {
    }
    return
  }
  func.func @transform_0(%arg0: i32, %arg1: i32) -> (i32, i32) {
    %c0_i32 = arith.constant 0 : i32
    %c0_i32_0 = arith.constant 0 : i32
    return %arg0, %c0_i32 : i32, i32
  }
  func.func @transform_1(%arg0: i32, %arg1: i32) -> (i32, i32) {
    %c0_i32 = arith.constant 0 : i32
    %c0_i32_0 = arith.constant 0 : i32
    return %arg1, %c0_i32 : i32, i32
  }
  func.func @transform_2(%arg0: i32, %arg1: i32) -> (i32, i32) {
    %c0_i32 = arith.constant 0 : i32
    %c0_i32_0 = arith.constant 0 : i32
    %c0_i32_1 = arith.constant 0 : i32
    return %c0_i32, %c0_i32_0 : i32, i32
  }
}

</mosaic_0001>

<bundles_post_ra>
// kernel: tpu_custom_call.1
= control target key start
LH: loop header
LB: loop body
LE: loop exit
PB: predicated region body
PF: predicated region fallthrough
CT: control target
= control target key end

     0   :  { %7 = vsyncpa [#allocation8], 0  ;;  %s426_s0 = inlined_call_operand.hbm [shape: f32[8,32], index: 0, kind: input, shape index: {}]   ;;  %s427_s1 = inlined_call_operand.hbm [shape: f32[8,32], index: 1, kind: input, shape index: {}]   ;;  %s428_s2 = inlined_call_operand.hbm [shape: f32[1,1], index: 2, kind: output, shape index: {}]  }
   0x1   :  { %8 = vsyncpa [#allocation11], 0 }
   0x2   :  { %9 = vsyncpa [#allocation9], 0  ;;  %s353_s9 = smov [#allocation7]   ;;  %s354_s11 = smov [#allocation10]  }
   0x3   :  { %s16_s10 = sshll.u32 %s353_s9, 4  ;;  %s26_s12 = sshll.u32 %s354_s11, 4  ;;  %s17_s10 = int_to_ptr.vmem [resolvable:$true] %s16_s10  ;;  %s27_s12 = int_to_ptr.vmem [resolvable:$true] %s26_s12 }
   0x4   :  { %s281_s15 = scalar_lea.hbm %s426_s0, 128 }
   0x5   :  { %p282_p0 = scmp.ne.s32.totalorder %s426_s0, %s281_s15  ;;  %p285_p1 = scmp.lt.u32.totalorder %s281_s15, %s426_s0 }
   0x7   :  { %p287_p2 = pnand %p285_p1, %p282_p0 }
   0x9   :  { %290 = shalt.err (!%p287_p2)
}
   0xa   :  { %s291_s20 = scalar_lea.vmem %s17_s10, 128  ;;  %p296_p4 = scmp.lt.s32.totalorder %s17_s10, %s17_s10 }
   0xb   :  { %p292_p3 = scmp.ne.s32.totalorder %s17_s10, %s291_s20  ;;  %p297_p5 = scmp.lt.s32.totalorder %s291_s20, %s291_s20 }
   0xd   :  { %p298_p6 = por %p297_p5, %p296_p4 }
   0xf   :  { %p299_p7 = pnand %p298_p6, %p292_p3 }
  0x11   :  { %302 = shalt.err (!%p299_p7)
}
  0x12   :  { %19 = dma.hbm_to_vmem [thread:$0]  %s426_s0, 128, %s17_s10, [#allocation8]  }
  0x13   :  { %s303_s25 = scalar_lea.hbm %s427_s1, 128 }
  0x14   :  { %p304_p8 = scmp.ne.s32.totalorder %s427_s1, %s303_s25  ;;  %p307_p9 = scmp.lt.u32.totalorder %s303_s25, %s427_s1 }
  0x16   :  { %p309_p10 = pnand %p307_p9, %p304_p8 }
  0x18   :  { %312 = shalt.err (!%p309_p10)
}
  0x19   :  { %s313_s30 = scalar_lea.vmem %s27_s12, 128  ;;  %p318_p12 = scmp.lt.s32.totalorder %s27_s12, %s27_s12 }
  0x1a   :  { %p314_p11 = scmp.ne.s32.totalorder %s27_s12, %s313_s30  ;;  %p319_p13 = scmp.lt.s32.totalorder %s313_s30, %s313_s30 }
  0x1c   :  { %p320_p0 = por %p319_p13, %p318_p12 }
  0x1e   :  { %p321_p1 = pnand %p320_p0, %p314_p11 }
  0x20   :  { %324 = shalt.err (!%p321_p1)
}
  0x21   :  { %29 = dma.hbm_to_vmem [thread:$0]  %s427_s1, 128, %s27_s12, [#allocation11]  }
  0x22   :  { %347 = dma.done.wait [#allocation8], 128  }
  0x23   :  { %348 = vsyncadd [#allocation8], 4294967168 }
  0x24   :  { %349 = dma.done.wait [#allocation11], 128  }
  0x25   :  { %350 = vsyncadd [#allocation11], 4294967168  ;;  %v54_v0 = vld [vmem:[#allocation10] sm:$0xff]  ;;  %vm56_vm0 = vcmask 261120   ;;  %v53_v1 = vld [vmem:[#allocation7] sm:$0xff]  ;;  %vm45_vm1 = vcmask 7168  }
  0x26   :  { %v70_v2 = vmul.f32 %v54_v0, %v54_v0  ;;  %v55_v3 = vmul.f32 %v53_v1, %v53_v1  ;;  %v355_v6 = vmov 0.0   ;;  %vm356_vm2 = vmmov 0   ;;  %s357_s6 = smov [#allocation12]  }
  0x27   :  { %46 = vst.msk [vmem:[#allocation5] sm:$0xff] %vm45_vm1, %v355_v6  ;;  %47 = vst.msk [vmem:[#allocation6] sm:$0xff] %vm45_vm1, %v355_v6  ;;  %250 = vmatprep.subr.bf16.mxu0 %v355_v6  ;;  %252 = vmatprep.mubr.msk.bf16.mxu0 %vm356_vm2, %v355_v6  ;;  %vm43_vm7 = vcmask 57344   ;;  %vm150_vm8 = vcmask 64512   ;;  %s236_s7 = sshll.u32 %s357_s6, 4  ;;  %vm228_vm9 = vcmask 0   ;;  %s237_s7 = int_to_ptr.vmem [resolvable:$true] %s236_s7 }
  0x28   :  { %v71_v4 = vsel %vm56_vm0, %v70_v2, 0.0  ;;  %v57_v5 = vsel %vm56_vm0, %v55_v3, 0.0  ;;  %52 = vst.msk [vmem:[#allocation2] sm:$0xff] %vm45_vm1, %v355_v6  ;;  %s325_s8 = scalar_lea.vmem %s237_s7, 16  ;;  %s329_s9 = scalar_lea.vmem %s237_s7, 32 }
  0x29   :  { %72 = vadd.xlane.f32.xlu0 %v71_v4  ;;  %44 = vst.msk [vmem:[#allocation4] sm:$0x1] %vm43_vm7, %v355_v6  ;;  %p326_p2 = scmp.ne.s32.totalorder %s237_s7, %s325_s8  ;;  %p330_p3 = scmp.lt.s32.totalorder %s237_s7, %s237_s7 }
  0x2a   :  { %p331_p4 = scmp.lt.s32.totalorder %s329_s9, %s325_s8 }
  0x2c   :  { %p332_p5 = por %p331_p4, %p330_p3 }
  0x2d   :  { %58 = vadd.xlane.f32.xlu0 %v57_v5 }
  0x2e   :  { %v177_v53 = vld [vmem:[#allocation6] sm:$0xff]  ;;  %v174_v59 = vld [vmem:[#allocation5] sm:$0xff]  ;;  %p333_p6 = pnand %p332_p5, %p326_p2 }
  0x2f   :  { %v149_v47 = vld [vmem:[#allocation2] sm:$0xff] }
  0x30   :  { %v157_v44 = vld [vmem:[#allocation4] sm:$0x1] }
  0xb6   :  { %v73_v7 = vpop.xlane.xlu0 %72 }
  0xb7   :  { %267 = vrsqrt.f32 %v73_v7  ;;  %vm76_vm3 = vcmp.eq.f32.partialorder %v73_v7, inf  ;;  %v79_v11 = vand.u32 2147483648, %v73_v7  ;;  %vm78_vm4 = vcmp.eq.f32.partialorder %v73_v7, 0.0 }
  0xba   :  { %v59_v8 = vpop.xlane.xlu0 %58 }
  0xbb   :  { %269 = vrsqrt.f32 %v59_v8  ;;  %vm62_vm5 = vcmp.eq.f32.partialorder %v59_v8, inf  ;;  %v65_v17 = vand.u32 2147483648, %v59_v8  ;;  %vm64_vm6 = vcmp.eq.f32.partialorder %v59_v8, 0.0 }
  0xc1   :  { %v268_v9 = vpop.eup %267 }
  0xc2   :  { %v75_v10 = vmul.f32 %v268_v9, %v73_v7 }
  0xc4   :  { %v77_v12 = vsel %vm76_vm3, %v73_v7, %v75_v10 }
  0xc5   :  { %v270_v13 = vpop.eup %269  ;;  %v80_v14 = vsel %vm78_vm4, %v79_v11, %v77_v12 }
  0xc6   :  { %v81_v15 = vmax.f32 %v80_v14, 1e-12  ;;  %v61_v16 = vmul.f32 %v270_v13, %v59_v8 }
  0xc8   :  { %271 = vrcp.f32 %v81_v15  ;;  %v63_v18 = vsel %vm62_vm5, %v59_v8, %v61_v16 }
  0xc9   :  { %v66_v19 = vsel %vm64_vm6, %v65_v17, %v63_v18 }
  0xca   :  { %v67_v20 = vmax.f32 %v66_v19, 1e-12 }
  0xcc   :  { %273 = vrcp.f32 %v67_v20 }
  0xd2   :  { %v272_v21 = vpop.eup %271 }
  0xd3   :  { %v85_v22 = vmul.f32 %v272_v21, %v54_v0 }
  0xd5   :  { %v98_v23 = vpack.c.bf16 %v85_v22, %v85_v22 }
  0xd6   :  { %v274_v24 = vpop.eup %273 }
  0xd7   :  { %v103_v25 = vsel %vm56_vm0, %v98_v23, 0  ;;  %v84_v26 = vmul.f32 %v274_v24, %v53_v1 }
  0xd8   :  { %251 = vmatpush3.bf16.xpose.msra.mxu0 %v103_v25 }
  0xd9   :  { %v90_v27 = vmul.f32 %v85_v22, %v84_v26  ;;  %v97_v28 = vpack.c.bf16 %v84_v26, %v84_v26 }
  0xdb   :  { %v91_v40 = vsel %vm56_vm0, %v90_v27, 0.0 }
  0xdf   :  { %253 = vmatmul.mubr.msk.bf16.vlgmr.msra.gmra.mrb[0].mxu0 %vm56_vm0, %v97_v28 }
 0x1b2   :  { %v139_v29 = vpop.f32.mrb[0].mxu0 }
 0x1b3   :  { %v145_v30 = vmul.f32 2.0, %v139_v29  ;;  %v254_v31 = vpop.f32.mrb[1].mxu0 }
 0x1b4   :  { %v142_v32 = vpop.f32.mrb[2].mxu0 }
 0x1b5   :  { %v247_v33 = vadd.f32 -2.0, %v145_v30  ;;  %v255_v34 = vpop.f32.mrb[3].mxu0 }
 0x1b7   :  { %v147_v35 = vmul.f32 1.442695, %v247_v33 }
 0x1b9   :  { %275 = vpow2.f32 %v147_v35 }
 0x1c3   :  { %v276_v36 = vpop.eup %275 }
 0x1c4   :  { %v151_v37 = vsel %vm150_vm8, %v276_v36, 0.0 }
 0x1c5   :  { %152 = vadd.xlane.f32.xlu1 %v151_v37  ;;  %v158_v38 = vrot.slane %v151_v37, 4 }
 0x1c7   :  { %v159_v39 = vadd.f32 %v158_v38, %v151_v37 }
 0x1c9   :  { %v160_v41 = vrot.slane %v159_v39, 2  ;;  %92 = vadd.xlane.f32.xlu1 %v91_v40 }
 0x1cb   :  { %v161_v42 = vadd.f32 %v160_v41, %v159_v39 }
 0x1cd   :  { %v162_v43 = vrot.slane %v161_v42, 1 }
 0x1cf   :  { %v163_v45 = vadd.f32 %v162_v43, %v161_v42 }
 0x1d1   :  { %v164_v46 = vadd.f32 %v163_v45, %v157_v44 }
 0x1d3   :  { %166 = vst.msk [vmem:[#allocation4] sm:$0x1] %vm43_vm7, %v164_v46 }
 0x1da   :  { %v207_v56 = vld [vmem:[#allocation4] sm:$0x1] }
 0x252   :  { %v153_v48 = vpop.xlane.xlu1 %152 }
 0x253   :  { %v154_v49 = vadd.f32 %v153_v48, %v149_v47 }
 0x255   :  { %156 = vst.msk [vmem:[#allocation2] sm:$0xff] %vm45_vm1, %v154_v49 }
 0x256   :  { %v93_v50 = vpop.xlane.xlu1 %92 }
 0x257   :  { %v94_v51 = vmul.f32 2.0, %v93_v50 }
 0x259   :  { %96 = vst.msk [vmem:[#allocation3] sm:$0xff] %vm45_vm1, %v94_v51 }
 0x25c   :  { %v170_v52 = vld [vmem:[#allocation2] sm:$0xff] }
 0x25d   :  { %277 = vlog2.f32 %v170_v52 }
 0x25e   :  { %279 = vlog2.f32 %v207_v56 }
 0x260   :  { %v178_v54 = vld [vmem:[#allocation3] sm:$0xff] }
 0x261   :  { %v179_v55 = vadd.f32 %v178_v54, %v177_v53 }
 0x263   :  { %180 = vst.msk [vmem:[#allocation6] sm:$0xff] %vm45_vm1, %v179_v55 }
 0x267   :  { %v278_v57 = vpop.eup %277 }
 0x268   :  { %v172_v58 = vmul.f32 0.6931472, %v278_v57  ;;  %v280_v0 = vpop.eup %279 }
 0x269   :  { %v209_v3 = vmul.f32 0.6931472, %v280_v0 }
 0x26a   :  { %v195_v60 = vld [vmem:[#allocation6] sm:$0xff]  ;;  %v173_v61 = vadd.f32 2.0, %v172_v58 }
 0x26b   :  { %v196_v62 = vsel %vm45_vm1, %v195_v60, 0.0  ;;  %v210_v4 = vsel %vm43_vm7, %v209_v3, 0.0 }
 0x26c   :  { %197 = vadd.xlane.f32.xlu1 %v196_v62  ;;  %v175_v63 = vadd.f32 %v174_v59, %v173_v61 }
 0x26e   :  { %176 = vst.msk [vmem:[#allocation5] sm:$0xff] %vm45_vm1, %v175_v63 }
 0x275   :  { %v183_v1 = vld [vmem:[#allocation5] sm:$0xff] }
 0x276   :  { %v184_v2 = vsel %vm45_vm1, %v183_v1, 0.0 }
 0x277   :  { %185 = vadd.xlane.f32.xlu0 %v184_v2 }
 0x27b   :  { %211 = vadd.xlane.f32.xlu0 %v210_v4 }
 0x2f9   :  { %v198_v5 = vpop.xlane.xlu1 %197 }
 0x2fa   :  { %v199_v6 = vrot.slane %v198_v5, 4 }
 0x2fc   :  { %v200_v7 = vadd.f32 %v199_v6, %v198_v5 }
 0x2fe   :  { %v201_v8 = vrot.slane %v200_v7, 2 }
 0x300   :  { %v202_v12 = vadd.f32 %v201_v8, %v200_v7 }
 0x302   :  { %v203_v18 = vrot.slane %v202_v12, 1 }
 0x304   :  { %v186_v9 = vpop.xlane.xlu0 %185  ;;  %v204_v23 = vadd.f32 %v203_v18, %v202_v12 }
 0x305   :  { %v187_v10 = vrot.slane %v186_v9, 4 }
 0x307   :  { %v188_v11 = vadd.f32 %v187_v10, %v186_v9 }
 0x308   :  { %v212_v13 = vpop.xlane.xlu0 %211 }
 0x309   :  { %v189_v14 = vrot.slane %v188_v11, 2  ;;  %v213_v15 = vrot.slane %v212_v13, 4 }
 0x30b   :  { %v214_v16 = vadd.f32 %v213_v15, %v212_v13  ;;  %v190_v17 = vadd.f32 %v189_v14, %v188_v11 }
 0x30d   :  { %v215_v19 = vrot.slane %v214_v16, 2  ;;  %v191_v20 = vrot.slane %v190_v17, 1 }
 0x30f   :  { %v216_v21 = vadd.f32 %v215_v19, %v214_v16  ;;  %v192_v22 = vadd.f32 %v191_v20, %v190_v17 }
 0x311   :  { %256 = vpush %v192_v22  ;;  %v217_v24 = vrot.slane %v216_v21, 1 }
 0x312   :  { %258 = vpush %v204_v23 }
 0x313   :  { %v218_v25 = vadd.f32 %v217_v24, %v216_v21 }
 0x315   :  { %260 = vpush %v218_v25 }
 0x342   :  { %s257_s1 = spop %256 }
 0x343   :  { %s259_s4 = spop %258  ;;  %v194_v29 = vstv %s257_s1 }
 0x344   :  { %v206_v26 = vstv %s259_s4 }
 0x345   :  { %v223_v30 = vmul.f32 2.0, %v206_v26 }
 0x346   :  { %s261_s5 = spop %260 }
 0x347   :  { %v220_v27 = vstv %s261_s5 }
 0x348   :  { %v221_v28 = vadd.f32 16.0, %v220_v27 }
 0x34a   :  { %v222_v31 = vadd.f32 %v221_v28, %v194_v29 }
 0x34c   :  { %v224_v32 = vsub.f32 %v222_v31, %v223_v30 }
 0x34e   :  { %v225_v33 = vmul.f32 0.5, %v224_v32 }
 0x350   :  { %v227_v34 = vmul.f32 0.125, %v225_v33 }
 0x352   :  { %229 = vst.msk [vmem:[#allocation12] sm:$0x1] %vm228_vm9, %v227_v34 }
 0x353   :  { %336 = shalt.err (!%p333_p6)
}
 0x354   :  { %s337_s12 = scalar_lea.hbm %s428_s2, 16 }
 0x355   :  { %p338_p7 = scmp.ne.s32.totalorder %s428_s2, %s337_s12  ;;  %p341_p8 = scmp.lt.u32.totalorder %s337_s12, %s428_s2 }
 0x357   :  { %p343_p9 = pnand %p341_p8, %p338_p7 }
 0x359   :  { %346 = shalt.err (!%p343_p9)
}
 0x35a   :  { %239 = dma.vmem_to_hbm [thread:$0]  %s237_s7, 16, %s428_s2, [#allocation9]  }
 0x35b   :  { %351 = dma.done.wait [#allocation9], 16  }
 0x35c   :  { %352 = vsyncadd [#allocation9], 4294967280 }
 0x35d   :  { %243 = vsyncpa [#allocation8], 1 }
 0x35e   :  { %244 = vsyncpa [#allocation11], 1 }
 0x35f   :  { %245 = vsyncpa [#allocation9], 1 }

</bundles_post_ra>
